<compile_context>
chip_gen: v7x
topology: tpu7x:2x2x1
jax: 0.10.0
libtpu: 0.0.40
codegen_flags: <defaults>
</compile_context>

<pallas_src>
import functools
import math

import jax
import jax.numpy as jnp
from jax.experimental import pallas as pl
from jax.experimental.pallas import tpu as pltpu


def _additive_attn_kernel(q_ref, k_ref, v_ref, vl_ref, wq_ref, wk_ref, wv_ref,
                          o_ref, *w_refs):
    # Shared weights: constant block index -> fetched into VMEM once.
    wq = wq_ref[...]                       # (H, Dq)
    wk = wk_ref[...]                       # (H, Dk)
    wv = wv_ref[...]                       # (1, H)

    bb, qlen, dq = q_ref.shape
    _, klen, dk = k_ref.shape
    h = wq.shape[0]

    # Projections: fold the batch block into rows -> one matmul per projection,
    # contracting the feature dims directly (x @ W^T, no weight transpose).
    q2 = q_ref[...].reshape(bb * qlen, dq)
    k2 = k_ref[...].reshape(bb * klen, dk)
    qh = jax.lax.dot_general(q2, wq, (((1,), (1,)), ((), ())),
                             preferred_element_type=jnp.float32).reshape(bb, qlen, h)
    kh = jax.lax.dot_general(k2, wk, (((1,), (1,)), ((), ())),
                             preferred_element_type=jnp.float32).reshape(bb, klen, h)

    # Additive-attention scores: w_v . tanh(qh_i + kh_j)
    feat = jnp.tanh(qh[:, :, None, :] + kh[:, None, :, :])          # (Bb, Q, K, H)
    scores = jnp.sum(feat * wv.reshape(1, 1, 1, h), axis=-1)        # (Bb, Q, K)

    # masked_softmax (mask value matches torch's -1000000.0)
    valid = vl_ref[...]                                             # (Bb, Q, 1) int32
    kidx = jax.lax.broadcasted_iota(jnp.int32, scores.shape, 2)
    scores = jnp.where(kidx < valid, scores, jnp.float32(-1e6))

    scores = scores - jnp.max(scores, axis=-1, keepdims=True)
    p = jnp.exp(scores)
    denom = jnp.sum(p, axis=-1, keepdims=True)
    w = p * pl.reciprocal(denom, approx=False)                      # (Bb, Q, K) f32

    # dropout(p=0) == identity; out = weights @ V (weights cast to V's dtype for MXU)
    v = v_ref[...]
    out = jnp.einsum("bqk,bkv->bqv", w.astype(v.dtype), v,
                     preferred_element_type=jnp.float32)
    o_ref[...] = out.astype(o_ref.dtype)
    if w_refs:                                                      # optional output
        w_refs[0][...] = w.astype(w_refs[0].dtype)


def _pick_batch_block(B, per_batch_bytes, target_bytes=2 << 20):
    """Largest divisor of B keeping tiles under ~2 MiB and >= 2 grid steps (megacore)."""
    divisors = [d for d in range(1, B + 1) if B % d == 0]
    good = [d for d in divisors
            if d * per_batch_bytes <= target_bytes and B // d >= 2]
    if good:
        return max(good)
    return 1 if B > 1 else B


@functools.partial(jax.jit, static_argnames=("return_weights", "batch_block"))
def additive_attention(queries, keys, values, W_q, W_k, w_v, valid_lens=None,
                       *, return_weights=True, batch_block=None):
    """Pallas additive attention. Returns output or (output, attention_weights)."""
    B, Q, Dq = queries.shape
    _, K, Dk = keys.shape
    V = values.shape[-1]
    H = W_q.shape[0]

    # valid_lens -> (B, Q, 1) int32 per-(batch, query) lengths (handles None / 1-D / 2-D).
    if valid_lens is None:
        vl = jnp.full((B, Q, 1), K, dtype=jnp.int32)
    elif valid_lens.ndim == 1:
        vl = jnp.broadcast_to(valid_lens.astype(jnp.int32)[:, None, None], (B, Q, 1))
    else:
        vl = valid_lens.astype(jnp.int32)[:, :, None]

    if batch_block is None:
        per_batch_bytes = 4 * (Q * Dq + K * Dk + K * V + Q * V + Q * K * (H + 1) + Q)
        batch_block = _pick_batch_block(B, per_batch_bytes)
    assert B % batch_block == 0, "batch_block must divide the batch size"
    Bb = batch_block
    grid = (B // Bb,)

    in_specs = [
        pl.BlockSpec((Bb, Q, Dq), lambda b: (b, 0, 0)),
        pl.BlockSpec((Bb, K, Dk), lambda b: (b, 0, 0)),
        pl.BlockSpec((Bb, K, V), lambda b: (b, 0, 0)),
        pl.BlockSpec((Bb, Q, 1), lambda b: (b, 0, 0)),
        pl.BlockSpec((H, Dq), lambda b: (0, 0)),
        pl.BlockSpec((H, Dk), lambda b: (0, 0)),
        pl.BlockSpec((1, H), lambda b: (0, 0)),
    ]
    out_shapes = [jax.ShapeDtypeStruct((B, Q, V), queries.dtype)]
    out_specs = [pl.BlockSpec((Bb, Q, V), lambda b: (b, 0, 0))]
    if return_weights:
        out_shapes.append(jax.ShapeDtypeStruct((B, Q, K), jnp.float32))
        out_specs.append(pl.BlockSpec((Bb, Q, K), lambda b: (b, 0, 0)))

    flops = (2 * B * Q * Dq * H + 2 * B * K * Dk * H        # projections
             + 3 * B * Q * K * H                            # add + weighted reduce
             + 5 * B * Q * K                                # softmax
             + 2 * B * Q * K * V)                           # PV matmul
    transcendentals = B * Q * K * H + B * Q * K             # tanh + exp
    bytes_accessed = 4 * (B * (Q * Dq + K * Dk + K * V + Q * V + Q)
                          + H * Dq + H * Dk + H
                          + (B * Q * K if return_weights else 0))

    results = pl.pallas_call(
        _additive_attn_kernel,
        grid_spec=pltpu.PrefetchScalarGridSpec(
            num_scalar_prefetch=0,
            grid=grid,
            in_specs=in_specs,
            out_specs=out_specs,
        ),
        out_shape=tuple(out_shapes),
        compiler_params=pltpu.CompilerParams(
            dimension_semantics=("parallel",)),
        cost_estimate=pl.CostEstimate(flops=flops,
                                      transcendentals=transcendentals,
                                      bytes_accessed=bytes_accessed),
    )(queries, keys, values, vl, W_q, W_k, w_v)

    if return_weights:
        return results[0], results[1]
    return results[0]


def _reference(queries, keys, values, W_q, W_k, w_v, valid_lens):
    """Pure-JAX reference mirroring the PyTorch AdditiveAttention forward."""
    qh = jnp.einsum("bqd,hd->bqh", queries, W_q)
    kh = jnp.einsum("bkd,hd->bkh", keys, W_k)
    feat = jnp.tanh(qh[:, :, None, :] + kh[:, None, :, :])
    scores = jnp.einsum("bqkh,oh->bqko", feat, w_v)[..., 0]         # (B, Q, K)
    if valid_lens is not None:
        if valid_lens.ndim == 1:
            vl = jnp.broadcast_to(valid_lens[:, None], scores.shape[:2])
        else:
            vl = valid_lens
        kidx = jnp.arange(scores.shape[-1])[None, None, :]
        scores = jnp.where(kidx < vl[:, :, None], scores, -1e6)
    w = jax.nn.softmax(scores, axis=-1)
    return jnp.einsum("bqk,bkv->bqv", w, values), w


if __name__ == "__main__":
    key = jax.random.PRNGKey(0)
    kq, kk, kv, kwq, kwk, kwv = jax.random.split(key, 6)

    B, Q, K, Dq, Dk, H, V = 4, 8, 8, 20, 16, 32, 16
    queries = jax.random.normal(kq, (B, Q, Dq), dtype=jnp.float32)
    keys = jax.random.normal(kk, (B, K, Dk), dtype=jnp.float32)
    values = jax.random.normal(kv, (B, K, V), dtype=jnp.float32)
    W_q = jax.random.normal(kwq, (H, Dq), dtype=jnp.float32) / math.sqrt(Dq)
    W_k = jax.random.normal(kwk, (H, Dk), dtype=jnp.float32) / math.sqrt(Dk)
    w_v = jax.random.normal(kwv, (1, H), dtype=jnp.float32) / math.sqrt(H)

    # 1-D (per-batch) valid_lens
    valid_lens = jnp.array([3, 6, 8, 5], dtype=jnp.int32)
    out, attn_w = additive_attention(queries, keys, values, W_q, W_k, w_v, valid_lens)
    out = jax.block_until_ready(out)
    attn_w = jax.block_until_ready(attn_w)
    ref_out, ref_w = _reference(queries, keys, values, W_q, W_k, w_v, valid_lens)
    assert jnp.allclose(out, ref_out, atol=1e-4, rtol=1e-4), "output mismatch (1-D lens)"
    assert jnp.allclose(attn_w, ref_w, atol=1e-4, rtol=1e-4), "weights mismatch (1-D lens)"

    # 2-D (per-query) valid_lens
    vl2d = (jnp.arange(B * Q, dtype=jnp.int32).reshape(B, Q) % K) + 1
    out2, attn_w2 = additive_attention(queries, keys, values, W_q, W_k, w_v, vl2d)
    out2 = jax.block_until_ready(out2)
    ref_out2, ref_w2 = _reference(queries, keys, values, W_q, W_k, w_v, vl2d)
    assert jnp.allclose(out2, ref_out2, atol=1e-4, rtol=1e-4), "output mismatch (2-D lens)"
    assert jnp.allclose(attn_w2, ref_w2, atol=1e-4, rtol=1e-4), "weights mismatch (2-D lens)"

    # valid_lens=None path, weights output dropped
    out3 = additive_attention(queries, keys, values, W_q, W_k, w_v, None,
                              return_weights=False)
    out3 = jax.block_until_ready(out3)
    ref_out3, _ = _reference(queries, keys, values, W_q, W_k, w_v, None)
    assert jnp.allclose(out3, ref_out3, atol=1e-4, rtol=1e-4), "output mismatch (no mask)"

    print("KERNEL_OK")
</pallas_src>

<mosaic_0001>
module attributes {stable_mosaic.version = 11 : i64} {
  func.func @_additive_attn_kernel(%arg0: i32, %arg1: memref<2x8x20xf32, #tpu.memory_space<vmem>>, %arg2: memref<2x8x16xf32, #tpu.memory_space<vmem>>, %arg3: memref<2x8x16xf32, #tpu.memory_space<vmem>>, %arg4: memref<2x8x1xi32, #tpu.memory_space<vmem>>, %arg5: memref<32x20xf32, #tpu.memory_space<vmem>>, %arg6: memref<32x16xf32, #tpu.memory_space<vmem>>, %arg7: memref<1x32xf32, #tpu.memory_space<vmem>>, %arg8: memref<2x8x16xf32, #tpu.memory_space<vmem>>, %arg9: memref<2x8x8xf32, #tpu.memory_space<vmem>>) attributes {dimension_semantics = [#tpu.dimension_semantics<parallel>], iteration_bounds = array<i64: 2>, scalar_prefetch = 0 : i64, scratch_operands = 0 : i64, tpu.core_type = #tpu.core_type<tc>, window_params = [{transform_indices = @transform_0, window_bounds = array<i64: 2, 8, 20>}, {transform_indices = @transform_1, window_bounds = array<i64: 2, 8, 16>}, {transform_indices = @transform_2, window_bounds = array<i64: 2, 8, 16>}, {transform_indices = @transform_3, window_bounds = array<i64: 2, 8, 1>}, {pipeline_mode = #tpu.pipeline_mode<synchronous>, transform_indices = @transform_4, window_bounds = array<i64: 32, 20>}, {pipeline_mode = #tpu.pipeline_mode<synchronous>, transform_indices = @transform_5, window_bounds = array<i64: 32, 16>}, {pipeline_mode = #tpu.pipeline_mode<synchronous>, transform_indices = @transform_6, window_bounds = array<i64: 1, 32>}, {transform_indices = @transform_7, window_bounds = array<i64: 2, 8, 16>}, {transform_indices = @transform_8, window_bounds = array<i64: 2, 8, 8>}]} {
    %c0 = arith.constant 0 : index
    %c0_0 = arith.constant 0 : index
    %0 = vector.load %arg5[%c0, %c0_0] : memref<32x20xf32, #tpu.memory_space<vmem>>, vector<32x20xf32>
    %c0_1 = arith.constant 0 : index
    %c0_2 = arith.constant 0 : index
    %1 = vector.load %arg6[%c0_1, %c0_2] : memref<32x16xf32, #tpu.memory_space<vmem>>, vector<32x16xf32>
    %c0_3 = arith.constant 0 : index
    %c0_4 = arith.constant 0 : index
    %2 = vector.load %arg7[%c0_3, %c0_4] : memref<1x32xf32, #tpu.memory_space<vmem>>, vector<1x32xf32>
    %c0_5 = arith.constant 0 : index
    %c0_6 = arith.constant 0 : index
    %c0_7 = arith.constant 0 : index
    %3 = vector.load %arg1[%c0_5, %c0_6, %c0_7] : memref<2x8x20xf32, #tpu.memory_space<vmem>>, vector<2x8x20xf32>
    %4 = vector.shape_cast %3 : vector<2x8x20xf32> to vector<16x20xf32>
    %c0_8 = arith.constant 0 : index
    %c0_9 = arith.constant 0 : index
    %c0_10 = arith.constant 0 : index
    %5 = vector.load %arg2[%c0_8, %c0_9, %c0_10] : memref<2x8x16xf32, #tpu.memory_space<vmem>>, vector<2x8x16xf32>
    %6 = vector.shape_cast %5 : vector<2x8x16xf32> to vector<16x16xf32>
    %cst = arith.constant dense<0.000000e+00> : vector<16x32xf32>
    %7 = tpu.matmul %4, %0, %cst {dimension_numbers = #tpu.dot_dimension_numbers<[1], [1], [0], [0], [0, 0, 1, 0], [], []>} : vector<16x20xf32>, vector<32x20xf32>, vector<16x32xf32> -> vector<16x32xf32>
    %8 = vector.shape_cast %7 : vector<16x32xf32> to vector<2x8x32xf32>
    %cst_11 = arith.constant dense<0.000000e+00> : vector<16x32xf32>
    %9 = tpu.matmul %6, %1, %cst_11 {dimension_numbers = #tpu.dot_dimension_numbers<[1], [1], [0], [0], [0, 0, 1, 0], [], []>} : vector<16x16xf32>, vector<32x16xf32>, vector<16x32xf32> -> vector<16x32xf32>
    %10 = vector.shape_cast %9 : vector<16x32xf32> to vector<2x8x32xf32>
    %11 = vector.shape_cast %8 : vector<2x8x32xf32> to vector<2x8x1x32xf32>
    %12 = vector.shape_cast %10 : vector<2x8x32xf32> to vector<2x1x8x32xf32>
    %13 = vector.broadcast %11 : vector<2x8x1x32xf32> to vector<2x8x8x32xf32>
    %14 = vector.broadcast %12 : vector<2x1x8x32xf32> to vector<2x8x8x32xf32>
    %15 = arith.addf %13, %14 : vector<2x8x8x32xf32>
    %16 = math.tanh %15 : vector<2x8x8x32xf32>
    %17 = vector.shape_cast %2 : vector<1x32xf32> to vector<1x1x1x32xf32>
    %18 = vector.broadcast %17 : vector<1x1x1x32xf32> to vector<2x8x8x32xf32>
    %19 = arith.mulf %16, %18 : vector<2x8x8x32xf32>
    %cst_12 = arith.constant dense<0.000000e+00> : vector<2x8x8xf32>
    %20 = vector.multi_reduction <add>, %19, %cst_12 [3] : vector<2x8x8x32xf32> to vector<2x8x8xf32>
    %c0_13 = arith.constant 0 : index
    %c0_14 = arith.constant 0 : index
    %c0_15 = arith.constant 0 : index
    %21 = vector.load %arg4[%c0_13, %c0_14, %c0_15] : memref<2x8x1xi32, #tpu.memory_space<vmem>>, vector<2x8x1xi32>
    %22 = tpu.iota {dimensions = array<i32: 2>} : vector<2x8x8xi32>
    %23 = vector.broadcast %21 : vector<2x8x1xi32> to vector<2x8x8xi32>
    %24 = arith.cmpi slt, %22, %23 : vector<2x8x8xi32>
    %cst_16 = arith.constant -1.000000e+06 : f32
    %25 = vector.broadcast %cst_16 : f32 to vector<2x8x8xf32>
    %26 = arith.select %24, %20, %25 : vector<2x8x8xi1>, vector<2x8x8xf32>
    %cst_17 = arith.constant dense<0xFF800000> : vector<2x8xf32>
    %27 = vector.multi_reduction <maximumf>, %26, %cst_17 [2] : vector<2x8x8xf32> to vector<2x8xf32>
    %28 = vector.shape_cast %27 : vector<2x8xf32> to vector<2x8x1xf32>
    %29 = vector.broadcast %28 : vector<2x8x1xf32> to vector<2x8x8xf32>
    %30 = arith.subf %26, %29 : vector<2x8x8xf32>
    %31 = math.exp %30 : vector<2x8x8xf32>
    %cst_18 = arith.constant dense<0.000000e+00> : vector<2x8xf32>
    %32 = vector.multi_reduction <add>, %31, %cst_18 [2] : vector<2x8x8xf32> to vector<2x8xf32>
    %33 = vector.shape_cast %32 : vector<2x8xf32> to vector<2x8x1xf32>
    %34 = tpu.reciprocal %33 : vector<2x8x1xf32> -> vector<2x8x1xf32>
    %35 = vector.broadcast %34 : vector<2x8x1xf32> to vector<2x8x8xf32>
    %36 = arith.mulf %31, %35 : vector<2x8x8xf32>
    %c0_19 = arith.constant 0 : index
    %c0_20 = arith.constant 0 : index
    %c0_21 = arith.constant 0 : index
    %37 = vector.load %arg3[%c0_19, %c0_20, %c0_21] : memref<2x8x16xf32, #tpu.memory_space<vmem>>, vector<2x8x16xf32>
    "tpu.trace_start"() <{level = 10 : i32, message = "bqk,bkv->bqv"}> : () -> ()
    %cst_22 = arith.constant dense<0.000000e+00> : vector<2x8x16xf32>
    %38 = tpu.matmul %36, %37, %cst_22 {dimension_numbers = #tpu.dot_dimension_numbers<[2], [1], [1], [2], [0, 0, 0, 1, 1, 2], [0], [0]>} : vector<2x8x8xf32>, vector<2x8x16xf32>, vector<2x8x16xf32> -> vector<2x8x16xf32>
    "tpu.trace_stop"() : () -> ()
    %c0_23 = arith.constant 0 : index
    %c0_24 = arith.constant 0 : index
    %c0_25 = arith.constant 0 : index
    %39 = vector.load %arg8[%c0_23, %c0_24, %c0_25] : memref<2x8x16xf32, #tpu.memory_space<vmem>>, vector<2x8x16xf32>
    tpu.vector_store %arg8[%c0_23, %c0_24, %c0_25], %38 {strides = array<i32>} : memref<2x8x16xf32, #tpu.memory_space<vmem>>, vector<2x8x16xf32>,
    %c0_26 = arith.constant 0 : index
    %c0_27 = arith.constant 0 : index
    %c0_28 = arith.constant 0 : index
    %40 = vector.load %arg9[%c0_26, %c0_27, %c0_28] : memref<2x8x8xf32, #tpu.memory_space<vmem>>, vector<2x8x8xf32>
    tpu.vector_store %arg9[%c0_26, %c0_27, %c0_28], %36 {strides = array<i32>} : memref<2x8x8xf32, #tpu.memory_space<vmem>>, vector<2x8x8xf32>,
    return
  }
  func.func @transform_0(%arg0: i32) -> (i32, i32, i32) {
    %c0_i32 = arith.constant 0 : i32
    %c0_i32_0 = arith.constant 0 : i32
    %c0_i32_1 = arith.constant 0 : i32
    return %arg0, %c0_i32, %c0_i32_0 : i32, i32, i32
  }
  func.func @transform_1(%arg0: i32) -> (i32, i32, i32) {
    %c0_i32 = arith.constant 0 : i32
    %c0_i32_0 = arith.constant 0 : i32
    %c0_i32_1 = arith.constant 0 : i32
    return %arg0, %c0_i32, %c0_i32_0 : i32, i32, i32
  }
  func.func @transform_2(%arg0: i32) -> (i32, i32, i32) {
    %c0_i32 = arith.constant 0 : i32
    %c0_i32_0 = arith.constant 0 : i32
    %c0_i32_1 = arith.constant 0 : i32
    return %arg0, %c0_i32, %c0_i32_0 : i32, i32, i32
  }
  func.func @transform_3(%arg0: i32) -> (i32, i32, i32) {
    %c0_i32 = arith.constant 0 : i32
    %c0_i32_0 = arith.constant 0 : i32
    %c0_i32_1 = arith.constant 0 : i32
    return %arg0, %c0_i32, %c0_i32_0 : i32, i32, i32
  }
  func.func @transform_4(%arg0: i32) -> (i32, i32) {
    %c0_i32 = arith.constant 0 : i32
    %c0_i32_0 = arith.constant 0 : i32
    %c0_i32_1 = arith.constant 0 : i32
    return %c0_i32, %c0_i32_0 : i32, i32
  }
  func.func @transform_5(%arg0: i32) -> (i32, i32) {
    %c0_i32 = arith.constant 0 : i32
    %c0_i32_0 = arith.constant 0 : i32
    %c0_i32_1 = arith.constant 0 : i32
    return %c0_i32, %c0_i32_0 : i32, i32
  }
  func.func @transform_6(%arg0: i32) -> (i32, i32) {
    %c0_i32 = arith.constant 0 : i32
    %c0_i32_0 = arith.constant 0 : i32
    %c0_i32_1 = arith.constant 0 : i32
    return %c0_i32, %c0_i32_0 : i32, i32
  }
  func.func @transform_7(%arg0: i32) -> (i32, i32, i32) {
    %c0_i32 = arith.constant 0 : i32
    %c0_i32_0 = arith.constant 0 : i32
    %c0_i32_1 = arith.constant 0 : i32
    return %arg0, %c0_i32, %c0_i32_0 : i32, i32, i32
  }
  func.func @transform_8(%arg0: i32) -> (i32, i32, i32) {
    %c0_i32 = arith.constant 0 : i32
    %c0_i32_0 = arith.constant 0 : i32
    %c0_i32_1 = arith.constant 0 : i32
    return %arg0, %c0_i32, %c0_i32_0 : i32, i32, i32
  }
}

</mosaic_0001>

<bundles_post_ra>
// kernel: additive_attention.1
= control target key start
LH: loop header
LB: loop body
LE: loop exit
PB: predicated region body
PF: predicated region fallthrough
CT: control target
= control target key end

     0   :  { %14 = vsyncpa [#allocation3], 0  ;;  %s1967_s0 = inlined_call_operand.vmem [shape: f32[4,8,20], index: 0, kind: input, shape index: {}]   ;;  %s1968_s1 = inlined_call_operand.vmem [shape: f32[4,8,16], index: 1, kind: input, shape index: {}]   ;;  %s1969_s2 = inlined_call_operand.vmem [shape: f32[4,8,16], index: 2, kind: input, shape index: {}]   ;;  %s1970_s3 = inlined_call_operand.vmem [shape: s32[4,8,1], index: 3, kind: input, shape index: {}]   ;;  %s1971_s4 = inlined_call_operand.vmem [shape: f32[32,20], index: 4, kind: input, shape index: {}]   ;;  %s1972_s5 = inlined_call_operand.vmem [shape: f32[32,16], index: 5, kind: input, shape index: {}]   ;;  %s1973_s6 = inlined_call_operand.vmem [shape: f32[1,32], index: 6, kind: input, shape index: {}]   ;;  %s1974_s7 = inlined_call_operand.hbm [shape: f32[4,8,16], index: 7, kind: output, shape index: {0}]   ;;  %s1975_s8 = inlined_call_operand.hbm [shape: f32[4,8,8], index: 8, kind: output, shape index: {1}]  }
   0x1   :  { %16 = vsyncpa [#allocation3 + $0x1], 0 }
   0x2   :  { %17 = vsyncpa [#allocation5], 0 }
   0x3   :  { %19 = vsyncpa [#allocation5 + $0x1], 0  ;;  %s1678_s27 = smov 0   ;;  %s1680_s28 = smov 0  }
   0x4   :  { %s1682_s29 = smov 0   ;;  %s1684_s30 = smov 0  }
   0x5 LB: > { %s1699_s9 = sadd.s32 4294967295, %s1623_s30   ;;  %s1326_s10 = sadd.s32 4294967294, %s1623_s30   ;;  %s1623_s30 = sphi %s1684_s30, %s1987_s30   ;;  %s1619_s29 = sphi %s1682_s29, %s1986_s29   ;;  %s1615_s28 = sphi %s1680_s28, %s1985_s28   ;;  %s1611_s27 = sphi %s1678_s27, %s1984_s27  }
   0x6   : > { %s1703_s11 = sadd.s32 1, %s1623_s30   ;;  %s199_s12 = sadd.s32 1, %s1619_s29 }
   0x7   : > { %s196_s13 = ssub.s32 %s1623_s30, %s1703_s11  ;;  %p209_p0 = scmp.ne.s32.totalorder %s1619_s29, %s1615_s28 }
   0x8   : > { %p197_p1 = scmp.eq.s32.totalorder %s196_s13, 0  ;;  %p210_p2 = scmp.eq.s32.totalorder %s1699_s9, 1 }
   0x9   : > { %p215_p3 = scmp.ne.s32.totalorder %s1615_s28, %s1611_s27  ;;  %p216_p4 = scmp.eq.s32.totalorder %s1326_s10, 1 }
   0xa   : > { %s1714_s14 = scalar_select %p197_p1, %s1619_s29, %s199_s12  }
   0xb   : > { %p1716_p5 = por %p210_p2, %p209_p0  ;;  %p1720_p6 = por %p216_p4, %p215_p3 }
   0xc   : > { %p1329_p7 = scmp.ge.s32.totalorder %s1623_s30, 1  ;;  %p305_p8 = scmp.lt.s32.totalorder %s1623_s30, 3 }
   0xe   : > { %p306_p9 = pnand %p1329_p7, %p305_p8 }
   0xf   : > { %v385_v0 = vld [vmem:[%s1971_s4] sm:$0xff] (!%p306_p9)  ;;  %v386_v1 = vld [vmem:[%s1971_s4 + $0x8] sm:$0xff] (!%p306_p9)  ;;  %vm398_vm0 = vcmask (!%p306_p9), 162816   ;;  %vm492_vm1 = vcmask (!%p306_p9), 130048   ;;  %s1332_s23 = sshll.u32 (!%p306_p9), %s1699_s9, 1  ;;  %v387_v6 = vld [vmem:[%s1971_s4 + $0x10] sm:$0xff] (!%p306_p9)  ;;  %v592_v21 = vlaneseq (!%p306_p9) }
  0x10   : > { %309 = sbr.rel (%p306_p9) target bundleno = 999 (0x3e7), region = 48  ;;  %v389_v2 = vld [vmem:[%s1972_s5] sm:$0xff] (!%p306_p9)  ;;  %v1413_v3 = vpack.c.bf16 (!%p306_p9), %v386_v1, %v385_v0  ;;  %vm1738_vm2 = vmpackc.low (!%p306_p9), %vm398_vm0, %vm398_vm0  ;;  %v390_v5 = vld [vmem:[%s1972_s5 + $0x8] sm:$0xff] (!%p306_p9)  ;;  %p360_p10 = scmp.lt.s32.totalorder (!%p306_p9), %s1332_s23, 3  ;;  %v1625_v18 = vmov (!%p306_p9), 0   ;;  %vm820_vm4 = vcmask (!%p306_p9), 261120  }
  0x11   : > { %v1425_v7 = vpack.c.bf16 (!%p306_p9), %v390_v5, %v389_v2  ;;  %vm1750_vm3 = vmpackc.low (!%p306_p9), %vm492_vm1, %vm492_vm1  ;;  %v388_v9 = vld [vmem:[%s1971_s4 + $0x18] sm:$0xff] (!%p306_p9)  ;;  %v391_v10 = vld [vmem:[%s1972_s5 + $0x10] sm:$0xff] (!%p306_p9)  ;;  %1488 = vset.pattern.permute.xlu1 (!%p306_p9), %v1625_v18  ;;  %1487 = vset.pattern.permute.xlu0 (!%p306_p9), %v1625_v18  ;;  %v1626_v19 = vmov (!%p306_p9), 1966171168   ;;  %v1794_v23 = vshrl.u32 (!%p306_p9), %v592_v21, 7  ;;  %vm961_vm5 = vcmask (!%p306_p9), 1041409  }
  0x12   : > { %1415 = vmatprep.subr.msk.bf16.mxu0 (!%p306_p9), %vm1738_vm2, %v1413_v3  ;;  %v1419_v11 = vpack.c.bf16 (!%p306_p9), %v388_v9, %v387_v6  ;;  %v392_v12 = vld [vmem:[%s1972_s5 + $0x18] sm:$0xff] (!%p306_p9)  ;;  %v590_v20 = vunpack.c.l.s4 (!%p306_p9), %v1626_v19  ;;  %vm963_vm6 = vcmask (!%p306_p9), 1042434   ;;  %vm965_vm7 = vcmask (!%p306_p9), 1043459   ;;  %s1629_s20 = smov (!%p306_p9), [#allocation4]  }
  0x13   : > { %1418 = vmatpush3.bf16.xpose.msk.msra.mxu0 (!%p306_p9), %vm1738_vm2, %v1413_v3  ;;  %1427 = vmatprep.subr.msk.bf16.mxu1 (!%p306_p9), %vm1750_vm3, %v1425_v7  ;;  %v1431_v13 = vpack.c.bf16 (!%p306_p9), %v392_v12, %v391_v10  ;;  %v688_v30 = vsub.s32 (!%p306_p9), 0, %v1794_v23  ;;  %vm967_vm8 = vcmask (!%p306_p9), 1044484   ;;  %vm969_vm9 = vcmask (!%p306_p9), 1045509   ;;  %s1533_s22 = sshll.u32 (!%p306_p9), %s1629_s20, 4  ;;  %s1534_s22 = int_to_ptr.vmem [resolvable:$false] %s1533_s22 }
  0x14   : > { %1430 = vmatpush3.bf16.xpose.msk.msra.mxu1 (!%p306_p9), %vm1750_vm3, %v1425_v7  ;;  %1421 = vmatprep.subr.msk.bf16.mxu0 (!%p306_p9), %vm1738_vm2, %v1419_v11  ;;  %v591_v22 = vunpack.c.0.s8 (!%p306_p9), %v590_v20  ;;  %vm971_vm10 = vcmask (!%p306_p9), 1046534   ;;  %vm973_vm11 = vcmask (!%p306_p9), 1047559   ;;  %vm986_vm12 = vcmask (!%p306_p9), 64512  }
  0x15   : > { %1433 = vmatprep.subr.msk.bf16.mxu1 (!%p306_p9), %vm1750_vm3, %v1431_v13  ;;  %vm1628_vm15 = vmmov (!%p306_p9), 0  }
  0x16   : > { %v594_v24 = vsub.s32 (!%p306_p9), %v591_v22, %v1794_v23 }
  0x17   : > { %s1989_s23 = smov (!%p360_p10, %s1332_s23), 3 }
  0x18   : > { %s1773_s21 = sshll.u32 %s1989_s23, 3 }
  0x19   : > { %s363_s25 = scalar_lea.vmem %s1967_s0, %s1773_s21  ;;  %s369_s12 = scalar_lea.vmem %s1968_s1, %s1773_s21 }
  0x1a   : > { %v394_v14 = vld [vmem:[%s363_s25] sm:$0xff]  ;;  %v395_v16 = vld [vmem:[%s363_s25 + $0x8] sm:$0xff]  ;;  %s381_s19 = scalar_lea.vmem %s1970_s3, %s1773_s21  ;;  %s375_s24 = scalar_lea.vmem %s1969_s2, %s1773_s21 }
  0x1b   : > { %v396_v15 = vld [vmem:[%s369_s12] sm:$0xff]  ;;  %1389 = vmatprep.mubr.msk.f32.mxu0 %vm398_vm0, %v394_v14  ;;  %1424 = vmatpush3.bf16.xpose.msk.msra.mxu0 %vm1738_vm2, %v1419_v11  ;;  %v397_v17 = vld [vmem:[%s369_s12 + $0x8] sm:$0xff]  ;;  %s1864_s25 = sand.u32 1, %s1615_s28   ;;  %s1976_s12 = sshll.u32 %s1699_s9, 8 }
  0x1c   : > { %1400 = vmatprep.mubr.msk.f32.mxu1 %vm492_vm1, %v396_v15  ;;  %1436 = vmatpush3.bf16.xpose.msk.msra.mxu1 %vm1750_vm3, %v1431_v13  ;;  %s1330_s21 = sshll.u32 %s1864_s25, 4  ;;  %s1881_s17 = scalar_lea.hbm %s1975_s8, %s1976_s12 }
  0x1d   : > { %s358_s26 = scalar_lea.vmem [#allocation4], %s1330_s21  ;;  %s1167_s18 = scalar_lea.sflag [#allocation5], %s1864_s25 }
  0x1e   : > { %s1196_s10 = sshll.u32 %s358_s26, 4  ;;  %s1873_s10 = int_to_ptr.vmem [resolvable:$true] %s1196_s10 }
  0x1f   : > { %p1536_p0 = scmp.lt.s32.totalorder %s1873_s10, %s1534_s22 }
  0x22   : > { %1390 = vmatmul.mubr.msk.f32.vlgmr.msra.gmra.mrb[0].mxu0 %vm398_vm0, %v395_v16 }
  0x23   : > { %1401 = vmatmul.mubr.msk.f32.vlgmr.msra.gmra.mrb[0].mxu1 %vm492_vm1, %v397_v17 }
  0xf5   : > { %v1391_v25 = vpop.f32.mrb[0].mxu0 }
  0xf6   : > { %v637_v26 = vcombine.high %v1391_v25, %v1391_v25  ;;  %v644_v27 = vrot.slane %v1391_v25, %v594_v24  ;;  %v483_v28 = vpop.f32.mrb[1].mxu0  ;;  %v1402_v29 = vpop.f32.mrb[0].mxu1 }
  0xf7   : > { %v588_v31 = vcombine.high %v483_v28, %v483_v28  ;;  %v595_v32 = vrot.slane %v483_v28, %v594_v24  ;;  %v577_v33 = vpop.f32.mrb[1].mxu1 }
  0xf8   : > { %v651_v34 = vrot.slane %v637_v26, %v594_v24  ;;  %v652_v35 = vcombine.high %v644_v27, %v644_v27  ;;  %v660_v36 = vrot.slane %v644_v27, %v594_v24  ;;  %v1801_v26 = vld [vmem:[%s1973_s6] ss:$0 sm:$0xff] }
  0xf9   : > { %v602_v37 = vrot.slane %v588_v31, %v594_v24  ;;  %v603_v38 = vcombine.high %v595_v32, %v595_v32  ;;  %v611_v39 = vrot.slane %v595_v32, %v594_v24 }
  0xfa   : > { %v653_v40 = vcombine.high %v651_v34, %v651_v34  ;;  %v667_v41 = vrot.slane %v651_v34, %v594_v24  ;;  %v674_v42 = vrot.slane %v652_v35, %v594_v24  ;;  %v682_v43 = vcombine.high %v660_v36, %v660_v36 }
  0xfb   : > { %v721_v44 = vrot.slane %v660_v36, %v688_v30  ;;  %v604_v45 = vcombine.high %v602_v37, %v602_v37  ;;  %v618_v46 = vrot.slane %v602_v37, %v594_v24  ;;  %v625_v47 = vrot.slane %v603_v38, %v594_v24 }
  0xfc   : > { %v681_v48 = vrot.slane %v653_v40, %v594_v24  ;;  %v683_v49 = vcombine.high %v667_v41, %v667_v41  ;;  %v684_v50 = vcombine.high %v674_v42, %v674_v42  ;;  %v725_v51 = vrot.slane %v674_v42, %v688_v30 }
  0xfd   : > { %v729_v52 = vrot.slane %v682_v43, %v688_v30  ;;  %v737_v53 = vrot.slane %v667_v41, %v688_v30  ;;  %v632_v54 = vrot.slane %v604_v45, %v594_v24  ;;  %v633_v55 = vcombine.high %v611_v39, %v611_v39 }
  0xfe   : > { %v685_v56 = vcombine.high %v681_v48, %v681_v48  ;;  %v733_v57 = vrot.slane %v684_v50, %v688_v30  ;;  %v741_v58 = vrot.slane %v681_v48, %v688_v30  ;;  %v745_v59 = vrot.slane %v683_v49, %v688_v30 }
  0xff   : > { %v634_v60 = vcombine.high %v618_v46, %v618_v46  ;;  %v635_v61 = vcombine.high %v625_v47, %v625_v47  ;;  %v636_v62 = vcombine.high %v632_v54, %v632_v54  ;;  %v689_v63 = vrot.slane %v611_v39, %v688_v30 }
 0x100   : > { %v749_v0 = vrot.slane %v685_v56, %v688_v30  ;;  %v693_v1 = vrot.slane %v625_v47, %v688_v30  ;;  %v697_v2 = vrot.slane %v633_v55, %v688_v30  ;;  %v705_v3 = vrot.slane %v618_v46, %v688_v30 }
 0x101   : > { %v701_v4 = vrot.slane %v635_v61, %v688_v30  ;;  %v709_v5 = vrot.slane %v632_v54, %v688_v30  ;;  %v713_v6 = vrot.slane %v634_v60, %v688_v30  ;;  %v717_v7 = vrot.slane %v636_v62, %v688_v30 }
 0x102   : > { %v774_v8 = vadd.f32 %v1402_v29, %v721_v44  ;;  %v766_v9 = vadd.f32 %v689_v63, %v577_v33  ;;  %v775_v10 = vadd.f32 %v1402_v29, %v725_v51  ;;  %v767_v11 = vadd.f32 %v693_v1, %v577_v33 }
 0x103   : > { %v776_v12 = vadd.f32 %v1402_v29, %v729_v52  ;;  %v768_v13 = vadd.f32 %v697_v2, %v577_v33  ;;  %v778_v14 = vadd.f32 %v1402_v29, %v737_v53  ;;  %v770_v15 = vadd.f32 %v705_v3, %v577_v33 }
 0x104   : > { %1489 = vtanh.f32 %v774_v8  ;;  %v777_v16 = vadd.f32 %v1402_v29, %v733_v57  ;;  %v769_v17 = vadd.f32 %v701_v4, %v577_v33  ;;  %v779_v18 = vadd.f32 %v1402_v29, %v741_v58 }
 0x105   : > { %1491 = vtanh.f32 %v766_v9  ;;  %v771_v19 = vadd.f32 %v709_v5, %v577_v33  ;;  %v780_v20 = vadd.f32 %v1402_v29, %v745_v59  ;;  %v772_v22 = vadd.f32 %v713_v6, %v577_v33 }
 0x106   : > { %1493 = vtanh.f32 %v775_v10  ;;  %v781_v24 = vadd.f32 %v1402_v29, %v749_v0  ;;  %v773_v25 = vadd.f32 %v717_v7, %v577_v33 }
 0x107   : > { %1495 = vtanh.f32 %v767_v11  ;;  %v870_v11 = vld [vmem:[%s381_s19 + $0x8] sm:$0xff] }
 0x108   : > { %1497 = vtanh.f32 %v776_v12  ;;  %v869_v12 = vld [vmem:[%s381_s19] sm:$0xff]  ;;  %s1529_s19 = scalar_lea.vmem %s1873_s10, 256 }
 0x109   : > { %1499 = vtanh.f32 %v768_v13  ;;  %p1530_p11 = scmp.ne.s32.totalorder %s1873_s10, %s1529_s19 }
 0x10a   : > { %1501 = vtanh.f32 %v778_v14 }
 0x10b   : > { %1503 = vtanh.f32 %v770_v15  ;;  %p1531_p12 = pnand %p1530_p11, %p1716_p5 }
 0x10c   : > { %1505 = vtanh.f32 %v777_v16 }
 0x10d   : > { %1507 = vtanh.f32 %v769_v17  ;;  %p1532_p13 = pneg %p1531_p12 }
 0x10e   : > { %v1490_v27 = vpop.eup %1489  ;;  %1509 = vtanh.f32 %v779_v18 }
 0x10f   : > { %v1492_v28 = vpop.eup %1491  ;;  %v812_v30 = vmul.f32 %v1490_v27, %v1801_v26  ;;  %1511 = vtanh.f32 %v771_v19 }
 0x110   : > { %v1494_v31 = vpop.eup %1493  ;;  %v804_v32 = vmul.f32 %v1492_v28, %v1801_v26  ;;  %1513 = vtanh.f32 %v780_v20 }
 0x111   : > { %v1496_v29 = vpop.eup %1495  ;;  %v845_v33 = vsel %vm820_vm4, %v812_v30, 0.0  ;;  %v813_v34 = vmul.f32 %v1494_v31, %v1801_v26  ;;  %1515 = vtanh.f32 %v772_v22  ;;  %v872_v22 = vand.u32 127, %v592_v21 }
 0x112   : > { %v1498_v35 = vpop.eup %1497  ;;  %846 = vadd.xlane.f32.xlu1 %v845_v33  ;;  %v821_v36 = vsel %vm820_vm4, %v804_v32, 0.0  ;;  %v805_v37 = vmul.f32 %v1496_v29, %v1801_v26  ;;  %1517 = vtanh.f32 %v781_v24 }
 0x113   : > { %v1500_v38 = vpop.eup %1499  ;;  %822 = vadd.xlane.f32.xlu0 %v821_v36  ;;  %v848_v39 = vsel %vm820_vm4, %v813_v34, 0.0  ;;  %v814_v40 = vmul.f32 %v1498_v35, %v1801_v26  ;;  %1519 = vtanh.f32 %v773_v25 }
 0x114   : > { %v1502_v41 = vpop.eup %1501  ;;  %v824_v42 = vsel %vm820_vm4, %v805_v37, 0.0  ;;  %v806_v43 = vmul.f32 %v1500_v38, %v1801_v26 }
 0x115   : > { %v1504_v44 = vpop.eup %1503  ;;  %v851_v45 = vsel %vm820_vm4, %v814_v40, 0.0  ;;  %v816_v46 = vmul.f32 %v1502_v41, %v1801_v26 }
 0x116   : > { %849 = vadd.xlane.f32.xlu1 %v848_v39  ;;  %v1506_v47 = vpop.eup %1505  ;;  %v827_v48 = vsel %vm820_vm4, %v806_v43, 0.0  ;;  %v808_v49 = vmul.f32 %v1504_v44, %v1801_v26 }
 0x117   : > { %825 = vadd.xlane.f32.xlu0 %v824_v42  ;;  %v1508_v50 = vpop.eup %1507  ;;  %v857_v51 = vsel %vm820_vm4, %v816_v46, 0.0  ;;  %v815_v52 = vmul.f32 %v1506_v47, %v1801_v26 }
 0x118   : > { %v1510_v53 = vpop.eup %1509  ;;  %v833_v54 = vsel %vm820_vm4, %v808_v49, 0.0  ;;  %v807_v55 = vmul.f32 %v1508_v50, %v1801_v26 }
 0x119   : > { %v1512_v56 = vpop.eup %1511  ;;  %v854_v57 = vsel %vm820_vm4, %v815_v52, 0.0  ;;  %v817_v58 = vmul.f32 %v1510_v53, %v1801_v26 }
 0x11a   : > { %852 = vadd.xlane.f32.xlu1 %v851_v45  ;;  %v1514_v59 = vpop.eup %1513  ;;  %v830_v60 = vsel %vm820_vm4, %v807_v55, 0.0  ;;  %v809_v61 = vmul.f32 %v1512_v56, %v1801_v26 }
 0x11b   : > { %828 = vadd.xlane.f32.xlu0 %v827_v48  ;;  %v1516_v62 = vpop.eup %1515  ;;  %v860_v63 = vsel %vm820_vm4, %v817_v58, 0.0  ;;  %v818_v0 = vmul.f32 %v1514_v59, %v1801_v26 }
 0x11c   : > { %v1518_v1 = vpop.eup %1517  ;;  %v836_v2 = vsel %vm820_vm4, %v809_v61, 0.0  ;;  %v810_v3 = vmul.f32 %v1516_v62, %v1801_v26 }
 0x11d   : > { %v1520_v4 = vpop.eup %1519  ;;  %v863_v5 = vsel %vm820_vm4, %v818_v0, 0.0  ;;  %v819_v6 = vmul.f32 %v1518_v1, %v1801_v26 }
 0x11e   : > { %858 = vadd.xlane.f32.xlu1 %v857_v51  ;;  %v839_v7 = vsel %vm820_vm4, %v810_v3, 0.0  ;;  %v811_v8 = vmul.f32 %v1520_v4, %v1801_v26  ;;  %v899_v26 = vsub.s32 %v872_v22, %v1794_v23 }
 0x11f   : > { %834 = vadd.xlane.f32.xlu0 %v833_v54  ;;  %v866_v9 = vsel %vm820_vm4, %v819_v6, 0.0 }
 0x120   : > { %v842_v10 = vsel %vm820_vm4, %v811_v8, 0.0 }
 0x122   : > { %855 = vadd.xlane.f32.xlu1 %v854_v57 }
 0x123   : > { %831 = vadd.xlane.f32.xlu0 %v830_v60 }
 0x126   : > { %861 = vadd.xlane.f32.xlu1 %v860_v63 }
 0x127   : > { %837 = vadd.xlane.f32.xlu0 %v836_v2 }
 0x12a   : > { %864 = vadd.xlane.f32.xlu1 %v863_v5 }
 0x12b   : > { %840 = vadd.xlane.f32.xlu0 %v839_v7 }
 0x12e   : > { %867 = vadd.xlane.f32.xlu1 %v866_v9 }
 0x12f   : > { %843 = vadd.xlane.f32.xlu0 %v842_v10 }
 0x13f   : > { %877 = vperm.xlu1 %1488, %v870_v11  }
 0x145   : > { %874 = vperm.xlu0 %1487, %v869_v12  }
 0x19f   : > { %v847_v13 = vpop.xlane.xlu1 %846 }
 0x1a0   : > { %v823_v14 = vpop.xlane.xlu0 %822  ;;  %v932_v32 = vrot.slane %v847_v13, %v899_v26  ;;  %v1627_v13 = vmov 0.0  }
 0x1a1   : > { %v900_v39 = vrot.slane %v823_v14, %v899_v26  ;;  %1403 = vmatprep.subr.mxu0 %v1627_v13  ;;  %v1009_v14 = vld [vmem:[%s375_s24] sm:$0xff]  ;;  %1405 = vmatprep.mubr.msk.f32.mxu0 %vm1628_vm15, %v1627_v13 }
 0x1a2   : > { %1404 = vmatpush3.msra.mxu0 %v1009_v14  ;;  %1408 = vmatprep.subr.mxu1 %v1627_v13 }
 0x1a3   : > { %v850_v15 = vpop.xlane.xlu1 %849  ;;  %1410 = vmatprep.mubr.msk.f32.mxu1 %vm1628_vm15, %v1627_v13 }
 0x1a4   : > { %v826_v16 = vpop.xlane.xlu0 %825  ;;  %v936_v28 = vrot.slane %v850_v15, %v899_v26  ;;  %v1010_v15 = vld [vmem:[%s375_s24 + $0x8] sm:$0xff]  ;;  %s1535_s24 = scalar_lea.vmem %s1534_s22, 512 }
 0x1a5   : > { %v904_v36 = vrot.slane %v826_v16, %v899_v26  ;;  %1409 = vmatpush3.msra.mxu1 %v1010_v15  ;;  %p1537_p1 = scmp.lt.s32.totalorder %s1535_s24, %s1529_s19 }
 0x1a6   : > { %v975_v34 = vsel %vm961_vm5, %v936_v28, %v932_v32 }
 0x1a7   : > { %v853_v17 = vpop.xlane.xlu1 %852  ;;  %v962_v45 = vsel %vm961_vm5, %v904_v36, %v900_v39  ;;  %p1538_p2 = por %p1537_p1, %p1536_p0 }
 0x1a8   : > { %v829_v18 = vpop.xlane.xlu0 %828  ;;  %v940_v31 = vrot.slane %v853_v17, %v899_v26 }
 0x1a9   : > { %v908_v37 = vrot.slane %v829_v18, %v899_v26  ;;  %p1539_p3 = pnand %p1538_p2, %p1532_p13 }
 0x1aa   : > { %v976_v21 = vsel %vm963_vm6, %v940_v31, %v975_v34 }
 0x1ab   : > { %v859_v19 = vpop.xlane.xlu1 %858  ;;  %v964_v47 = vsel %vm963_vm6, %v908_v37, %v962_v45 }
 0x1ac   : > { %v835_v20 = vpop.xlane.xlu0 %834  ;;  %v948_v40 = vrot.slane %v859_v19, %v899_v26 }
 0x1ad   : > { %v916_v54 = vrot.slane %v835_v20, %v899_v26 }
 0x1af   : > { %v856_v24 = vpop.xlane.xlu1 %855 }
 0x1b0   : > { %v832_v25 = vpop.xlane.xlu0 %831  ;;  %v944_v29 = vrot.slane %v856_v24, %v899_v26 }
 0x1b1   : > { %v912_v41 = vrot.slane %v832_v25, %v899_v26 }
 0x1b2   : > { %v977_v23 = vsel %vm965_vm7, %v944_v29, %v976_v21 }
 0x1b3   : > { %v862_v27 = vpop.xlane.xlu1 %861  ;;  %v978_v46 = vsel %vm967_vm8, %v948_v40, %v977_v23  ;;  %v966_v50 = vsel %vm965_vm7, %v912_v41, %v964_v47 }
 0x1b4   : > { %v838_v30 = vpop.xlane.xlu0 %837  ;;  %v952_v38 = vrot.slane %v862_v27, %v899_v26  ;;  %v968_v59 = vsel %vm967_vm8, %v916_v54, %v966_v50 }
 0x1b5   : > { %v920_v51 = vrot.slane %v838_v30, %v899_v26 }
 0x1b6   : > { %v979_v48 = vsel %vm969_vm9, %v952_v38, %v978_v46 }
 0x1b7   : > { %v865_v33 = vpop.xlane.xlu1 %864  ;;  %v970_v61 = vsel %vm969_vm9, %v920_v51, %v968_v59 }
 0x1b8   : > { %v841_v35 = vpop.xlane.xlu0 %840  ;;  %v956_v42 = vrot.slane %v865_v33, %v899_v26 }
 0x1b9   : > { %v924_v55 = vrot.slane %v841_v35, %v899_v26 }
 0x1ba   : > { %v980_v53 = vsel %vm971_vm10, %v956_v42, %v979_v48 }
 0x1bb   : > { %v868_v43 = vpop.xlane.xlu1 %867  ;;  %v972_v63 = vsel %vm971_vm10, %v924_v55, %v970_v61 }
 0x1bc   : > { %v960_v44 = vrot.slane %v868_v43, %v899_v26  ;;  %v844_v49 = vpop.xlane.xlu0 %843 }
 0x1bd   : > { %v928_v57 = vrot.slane %v844_v49, %v899_v26 }
 0x1be   : > { %v981_v56 = vsel %vm973_vm11, %v960_v44, %v980_v53 }
 0x1bf   : > { %v878_v52 = vpop.permute.xlu1 %877  ;;  %v974_v0 = vsel %vm973_vm11, %v928_v57, %v972_v63 }
 0x1c0   : > { %vm880_vm13 = vcmp.lt.s32.totalorder %v872_v22, %v878_v52 }
 0x1c1   : > { %v985_v58 = vsel %vm880_vm13, %v981_v56, -1000000.0 }
 0x1c2   : > { %v990_v60 = vsel %vm986_vm12, %v985_v58, -inf }
 0x1c3   : > { %991 = vmax.xlane.f32.xlu0 %v990_v60 }
 0x1c4   : > { %v875_v62 = vpop.permute.xlu0 %874 }
 0x1c5   : > { %vm879_vm14 = vcmp.lt.s32.totalorder %v872_v22, %v875_v62 }
 0x1c6   : > { %v984_v1 = vsel %vm879_vm14, %v974_v0, -1000000.0 }
 0x1c7   : > { %v987_v2 = vsel %vm986_vm12, %v984_v1, -inf }
 0x1c8   : > { %988 = vmax.xlane.f32.xlu1 %v987_v2 }
 0x250   : > { %v992_v3 = vpop.xlane.xlu0 %991 }
 0x251   : > { %v994_v4 = vsub.f32 %v985_v58, %v992_v3 }
 0x253   : > { %v997_v7 = vmul.f32 1.442695, %v994_v4 }
 0x255   : > { %v989_v5 = vpop.xlane.xlu1 %988 }
 0x256   : > { %v993_v6 = vsub.f32 %v984_v1, %v989_v5 }
 0x258   : > { %v995_v8 = vmul.f32 1.442695, %v993_v6 }
 0x25a   : > { %1521 = vpow2.f32 %v995_v8 }
 0x25b   : > { %1523 = vpow2.f32 %v997_v7 }
 0x264   : > { %v1522_v9 = vpop.eup %1521 }
 0x265   : > { %v999_v10 = vsel %vm986_vm12, %v1522_v9, 0.0  ;;  %v1524_v11 = vpop.eup %1523 }
 0x266   : > { %1000 = vadd.xlane.f32.xlu1 %v999_v10  ;;  %v1002_v12 = vsel %vm986_vm12, %v1524_v11, 0.0 }
 0x26a   : > { %1003 = vadd.xlane.f32.xlu1 %v1002_v12 }
 0x2f3   : > { %v1001_v16 = vpop.xlane.xlu1 %1000 }
 0x2f4   : > { %1525 = vrcp.f32 %v1001_v16 }
 0x2f7   : > { %v1004_v17 = vpop.xlane.xlu1 %1003 }
 0x2f8   : > { %1527 = vrcp.f32 %v1004_v17 }
 0x2fe   : > { %v1526_v18 = vpop.eup %1525 }
 0x2ff   : > { %v1007_v19 = vmul.f32 %v1526_v18, %v1522_v9 }
 0x301   : > { %1406 = vmatmul.mubr.msk.f32.vlgmr.msra.gmra.mrb[2].mxu0 %vm986_vm12, %v1007_v19  ;;  %1159 = vst.msk [vmem:[%s358_s26] sm:$0xff] %vm986_vm12, %v1007_v19 }
 0x302   : > { %v1528_v20 = vpop.eup %1527 }
 0x303   : > { %v1008_v22 = vmul.f32 %v1528_v20, %v1524_v11 }
 0x305   : > { %1411 = vmatmul.mubr.msk.f32.vlgmr.msra.gmra.mrb[2].mxu1 %vm986_vm12, %v1008_v22  ;;  %1160 = vst.msk [vmem:[%s358_s26 + $0x8] sm:$0xff] %vm986_vm12, %v1008_v22 }
 0x306   : > { %1542 = shalt.err (!%p1539_p3)
}
 0x307   : > { %s1543_s26 = scalar_lea.hbm %s1881_s17, 256  ;;  %s1547_s20 = scalar_lea.hbm %s1975_s8, 512 }
 0x308   : > { %p1544_p4 = scmp.ne.s32.totalorder %s1881_s17, %s1543_s26  ;;  %p1548_p9 = scmp.lt.u32.totalorder %s1881_s17, %s1975_s8 }
 0x309   : > { %p1549_p10 = scmp.lt.u32.totalorder %s1547_s20, %s1543_s26  ;;  %p1551_p12 = scmp.lt.u32.totalorder %s1543_s26, %s1881_s17 }
 0x30a   : > { %p1545_p7 = pnand %p1544_p4, %p1716_p5 }
 0x30b   : > { %p1550_p11 = por %p1549_p10, %p1548_p9 }
 0x30c   : > { %p1546_p8 = pneg %p1545_p7 }
 0x30d   : > { %p1552_p13 = por %p1551_p12, %p1550_p11 }
 0x30f   : > { %p1553_p0 = pnand %p1552_p13, %p1546_p8 }
 0x311   : > { %1556 = shalt.err (!%p1553_p0)
}
 0x312   : > { %s1630_s19 = smov 128   ;;  %s1631_s24 = smov 8  }
 0x313   : > { %1438 = dma.vmem_to_hbm [thread:$0]  (%p1716_p5), %s1873_s10, 256, %s1881_s17, %s1167_s18, %s1630_s19, %s1630_s19, %s1631_s24  }
 0x314   : > { %s351_s12 = scalar_lea.vmem [#allocation2], %s1330_s21  ;;  %s1983_s23 = sshll.u32 %s1699_s9, 8 }
 0x315   : > { %s1180_s26 = sshll.u32 %s351_s12, 4  ;;  %s1920_s22 = scalar_lea.hbm %s1974_s7, %s1983_s23  ;;  %s1913_s26 = int_to_ptr.vmem [resolvable:$true] %s1180_s26 }
 0x316   : > { %s1162_s21 = scalar_lea.sflag [#allocation3], %s1864_s25  ;;  %s1557_s10 = scalar_lea.vmem %s1913_s26, 256 }
 0x317   : > { %p1558_p1 = scmp.ne.s32.totalorder %s1913_s26, %s1557_s10  ;;  %s1632_s17 = smov [#allocation2]  }
 0x318   : > { %s1561_s9 = sshll.u32 %s1632_s17, 4  ;;  %s1562_s9 = int_to_ptr.vmem [resolvable:$false] %s1561_s9 }
 0x319   : > { %p1559_p2 = pnand %p1558_p1, %p1716_p5  ;;  %s1563_s18 = scalar_lea.vmem %s1562_s9, 512 }
 0x31a   : > { %p1564_p4 = scmp.lt.s32.totalorder %s1913_s26, %s1562_s9  ;;  %p1565_p7 = scmp.lt.s32.totalorder %s1563_s18, %s1557_s10 }
 0x31b   : > { %p1560_p3 = pneg %p1559_p2 }
 0x31c   : > { %p1566_p8 = por %p1565_p7, %p1564_p4 }
 0x31e   : > { %p1567_p9 = pnand %p1566_p8, %p1560_p3 }
 0x3d4   : > { %v1080_v24 = vpop.f32.mrb[2].mxu0 }
 0x3d5   : > { %1157 = vst.msk [vmem:[%s351_s12] sm:$0xff] %vm492_vm1, %v1080_v24  ;;  %v1407_v25 = vpop.f32.mrb[3].mxu0 }
 0x3d8   : > { %v1153_v26 = vpop.f32.mrb[2].mxu1 }
 0x3d9   : > { %1158 = vst.msk [vmem:[%s351_s12 + $0x8] sm:$0xff] %vm492_vm1, %v1153_v26  ;;  %v1412_v27 = vpop.f32.mrb[3].mxu1 }
 0x3da   : > { %1570 = shalt.err (!%p1567_p9)
}
 0x3db   : > { %s1571_s12 = scalar_lea.hbm %s1920_s22, 256  ;;  %s1575_s20 = scalar_lea.hbm %s1974_s7, 512 }
 0x3dc   : > { %p1572_p10 = scmp.ne.s32.totalorder %s1920_s22, %s1571_s12  ;;  %p1576_p13 = scmp.lt.u32.totalorder %s1920_s22, %s1974_s7 }
 0x3dd   : > { %p1577_p0 = scmp.lt.u32.totalorder %s1575_s20, %s1571_s12  ;;  %p1579_p2 = scmp.lt.u32.totalorder %s1571_s12, %s1920_s22 }
 0x3de   : > { %p1573_p11 = pnand %p1572_p10, %p1716_p5 }
 0x3df   : > { %p1578_p1 = por %p1577_p0, %p1576_p13 }
 0x3e0   : > { %p1574_p12 = pneg %p1573_p11 }
 0x3e1   : > { %p1580_p3 = por %p1579_p2, %p1578_p1 }
 0x3e3   : > { %p1581_p4 = pnand %p1580_p3, %p1574_p12 }
 0x3e5   : > { %1584 = shalt.err (!%p1581_p4)
}
 0x3e6   : > { %1437 = dma.vmem_to_hbm [thread:$0]  (%p1716_p5), %s1913_s26, 256, %s1920_s22, %s1162_s21, %s1630_s19, %s1630_s19, %s1631_s24  }
 0x3e7 PF: > { %p1448_p7 = scmp.ge.s32.totalorder %s1623_s30, 2  ;;  %s1211_s10 = sand.u32 1, %s1611_s27  }
 0x3e8   : > { %s1212_s18 = scalar_lea.sflag [#allocation3], %s1211_s10 }
 0x3e9   : > { %p1442_p8 = pnand %p1448_p7, %p1720_p6 }
 0x3eb   : > { %1602 = dma.done.wait (!%p1442_p8), %s1212_s18, 256  }
 0x3ec   : > { %1604 = vsyncadd (!%p1442_p8), %s1212_s18, 4294967040  ;;  %s1221_s15 = scalar_lea.sflag [#allocation5], %s1211_s10 }
 0x3ed   : > { %1606 = dma.done.wait (!%p1442_p8), %s1221_s15, 256  }
 0x3ee   : > { %1608 = vsyncadd (!%p1442_p8), %s1221_s15, 4294967040  ;;  %p22_p5 = scmp.ge.s32.totalorder %s1703_s11, 4   ;;  %s1984_s27 = smov %s1615_s28 }
 0x3ef   : > { %s1985_s28 = smov %s1619_s29  ;;  %s1986_s29 = smov %s1714_s14 }
 0x3f0   : > { %s1987_s30 = smov %s1703_s11  ;;  %24 = sbr.rel (!%p22_p5) target bundleno = 5 (0x5), region = 109 }
 0x3f7   :  { %1226 = vsyncpa [#allocation3], 1 }
 0x3f8   :  { %1228 = vsyncpa [#allocation3 + $0x1], 1 }
 0x3f9   :  { %1229 = vsyncpa [#allocation5], 1 }
 0x3fa   :  { %1231 = vsyncpa [#allocation5 + $0x1], 1 }

</bundles_post_ra>
